<compile_context>
chip_gen: v6e
topology: v6e:2x2x1
jax: 0.10.0
libtpu: 0.0.40
codegen_flags: <defaults>
</compile_context>

<pallas_src>
SYN_SIZE = 3        # L: number of syntactic edge-label channels
R = 4               # rank of the label factorization
BIAS = True         # Bias
BASELINE = False    # forward() takes the batch_rank_optimized_gcn_h path
#
# Design (follows the performance review):
#  * grid = (B,) only ("parallel" -> megacore sharding on v7x); all N output rows of a
#    batch are produced by one program, so there is no per-row grid-step overhead and no
#    ~96-byte per-row graph DMAs.  Output is written once per program as a full (N, H) slab.
#  * The j-sum is pulled ahead of the rank projection (exact algebra, O(N^2) -> O(N) work):
#        gsum[b,i,l] = sum_j graph[b,i,j,l]
#        s[b,i,r]    = sum_l gsum[b,i,l] * label_rank[l,r]      (= sum_j ranked_g[b,i,j,r])
#        u[b,i,r]    = sum_k nodes[b,i,k] * label_Q[k,r]
#        gc[b,i,h]   = sum_r u*s*label_P[r,h] + s*label_b[r,h]
#        norm[b,i]   = sum_l gsum[b,i,l] + 1e-10
#    so the only O(N^2) op left is a lane-dense reduction of the graph slab.
#  * graph is transposed in the wrapper to (B, L, N, N) so j sits on the lane axis
#    (dense lane/XLU reduce), i on sublanes; label_Q is pre-transposed so its rows are
#    lane-dense vector loads.
#  * The tiny L=3 / R=4 contractions never touch the MXU: they are unrolled as VPU
#    broadcast multiply-adds with H on the lane axis and N on sublanes; label_rank lives
#    in SMEM so its entries are plain scalar reads.
#  * Division by norm is routed to the EUP via pl.reciprocal.

import jax
import jax.numpy as jnp
from jax.experimental import pallas as pl
from jax.experimental.pallas import tpu as pltpu


def _gcn_kernel(lr_ref, g_ref, x_ref, lqt_ref, lp_ref, lb_ref, o_ref):
    # lr_ref : SMEM (L, R)      label_rank (scalar coefficients)
    # g_ref  : VMEM (L, N, N)   graph[b] transposed to [l, i, j]  (j on lanes)
    # x_ref  : VMEM (N, Hin)    nodes[b]
    # lqt_ref: VMEM (R, Hin)    label_Q^T
    # lp_ref : VMEM (R, H)      label_P
    # lb_ref : VMEM (R, H)      label_b
    # o_ref  : VMEM (N, H)      output[b]
    L, N, _ = g_ref.shape
    Rr, Hin = lqt_ref.shape
    H = lp_ref.shape[1]

    x = x_ref[...]        # (N, Hin)
    lqt = lqt_ref[...]    # (R, Hin)
    lp = lp_ref[...]      # (R, H)
    lb = lb_ref[...]      # (R, H)

    # Per-label j-sums (lane reduce on the XLU): gsum_l[i] = sum_j graph[b, i, j, l]
    gsums = [jnp.sum(g_ref[l], axis=-1, keepdims=True) for l in range(L)]      # L x (N, 1)
    norm = gsums[0]
    for l in range(1, L):
        norm = norm + gsums[l]
    norm = norm + 1e-10                                                        # (N, 1)

    # u[:, r] = nodes @ label_Q[:, r]  — unrolled over R, lane reduce over Hin
    us = [jnp.sum(x * lqt[r:r + 1, :], axis=-1, keepdims=True) for r in range(Rr)]  # R x (N, 1)

    # s[:, r] = sum_l gsum_l * label_rank[l, r]  — scalar coefficients from SMEM
    ss = []
    for r in range(Rr):
        s_r = gsums[0] * lr_ref[0, r]
        for l in range(1, L):
            s_r = s_r + gsums[l] * lr_ref[l, r]
        ss.append(s_r)                                                         # (N, 1)

    # gc = sum_r (u_r * s_r) * P[r, :] + s_r * b[r, :]  — outer-product FMAs, H on lanes
    acc = jnp.zeros((N, H), dtype=jnp.float32)
    for r in range(Rr):
        acc = acc + (us[r] * ss[r]) * lp[r:r + 1, :] + ss[r] * lb[r:r + 1, :]

    inv_norm = pl.reciprocal(norm, approx=False)                               # EUP slot
    o_ref[...] = jnp.maximum(acc * inv_norm, 0.0)                              # ReLU(h / norm)


def gcn_forward(graph, nodes, params):
    label_rank = params["label_rank"].astype(jnp.float32)   # (L, R)
    label_Q = params["label_Q"].astype(jnp.float32)          # (Hin, R)
    label_P = params["label_P"].astype(jnp.float32)          # (R, H)
    label_b = params["label_b"].astype(jnp.float32)          # (R, H)

    B, N, _, L = graph.shape
    Hin = nodes.shape[-1]
    H = label_P.shape[-1]
    Rr = label_P.shape[0]

    # Wrapper-side layout plumbing: j on the lane axis, label channel leading.
    graph_t = jnp.transpose(graph.astype(jnp.float32), (0, 3, 1, 2))   # (B, L, N, N)
    nodes_f = nodes.astype(jnp.float32)                                # (B, N, Hin)
    label_QT = label_Q.T                                               # (R, Hin)

    # NOTE: for very large N the (L, N, N) per-batch graph slab should be streamed in
    # j-tiles (and vmem_limit_bytes raised); at these shapes it fits trivially.
    return pl.pallas_call(
        _gcn_kernel,
        out_shape=jax.ShapeDtypeStruct((B, N, H), jnp.float32),
        grid=(B,),
        in_specs=[
            pl.BlockSpec(memory_space=pltpu.MemorySpace.SMEM),            # label_rank
            pl.BlockSpec((None, L, N, N), lambda b: (b, 0, 0, 0)),        # graph[b]
            pl.BlockSpec((None, N, Hin), lambda b: (b, 0, 0)),            # nodes[b]
            pl.BlockSpec((Rr, Hin), lambda b: (0, 0)),                    # label_Q^T
            pl.BlockSpec((Rr, H), lambda b: (0, 0)),                      # label_P
            pl.BlockSpec((Rr, H), lambda b: (0, 0)),                      # label_b
        ],
        out_specs=pl.BlockSpec((None, N, H), lambda b: (b, 0, 0)),
        compiler_params=pltpu.CompilerParams(
            dimension_semantics=("parallel",)),
    )(label_rank, graph_t, nodes_f, label_QT, label_P, label_b)


def ref_forward(graph, nodes, params):
    """Pure-JAX transcription of the PyTorch forward (BASELINE=False, Bias=True)."""
    g = graph.astype(jnp.float32)
    B, N = nodes.shape[0], nodes.shape[1]
    rg = jnp.einsum("bijl,lr->bijr", g, params["label_rank"])
    # Q @ diag(rg) @ P materialized per (b, i, j), then x @ w_tran (as torch does)
    w_tran = jnp.einsum("qr,bijr,rh->bijqh", params["label_Q"], rg, params["label_P"])
    part_a = jnp.einsum("biq,bijqh->bijh", nodes.astype(jnp.float32), w_tran)
    part_b = jnp.einsum("bijr,rh->bijh", rg, params["label_b"])
    gc = jnp.sum(part_a + part_b, axis=2)
    norm = jnp.sum(g.reshape(B, N, -1), axis=-1, keepdims=True) + 1e-10
    return jax.nn.relu(gc / norm)


def xavier_normal(key, shape):
    # deterministic synthetic stand-in for nn.init.xavier_normal_ (uses last two dims)
    fan_in, fan_out = shape[-2], shape[-1]
    std = (2.0 / (fan_in + fan_out)) ** 0.5
    return std * jax.random.normal(key, shape, dtype=jnp.float32)


if __name__ == "__main__":
    key = jax.random.PRNGKey(0)
    B, N = 2, 8
    INPUT_SIZE = 32
    HIDDEN_SIZE = 32

    ks = jax.random.split(key, 8)
    graph = (jax.random.uniform(ks[0], (B, N, N, SYN_SIZE)) > 0.5).astype(jnp.float32)
    nodes = jax.random.normal(ks[1], (B, N, INPUT_SIZE), dtype=jnp.float32)

    params = {
        # W / b exist in __init__ but are only used on the BASELINE path; created for parity.
        "W": xavier_normal(ks[2], (SYN_SIZE, INPUT_SIZE, HIDDEN_SIZE)),
        "b": xavier_normal(ks[3], (SYN_SIZE, HIDDEN_SIZE)),
        "label_rank": xavier_normal(ks[4], (SYN_SIZE, R)),
        "label_Q": xavier_normal(ks[5], (INPUT_SIZE, R)),
        "label_P": xavier_normal(ks[6], (R, HIDDEN_SIZE)),
        "label_b": xavier_normal(ks[7], (R, HIDDEN_SIZE)),
    }

    out = gcn_forward(graph, nodes, params)
    out = jax.block_until_ready(out)
    assert out.shape == (B, N, HIDDEN_SIZE)

    ref = ref_forward(graph, nodes, params)
    if not jnp.allclose(out, ref, atol=1e-4, rtol=1e-4):
        raise AssertionError("Pallas GCN output does not match reference")

    print("KERNEL_OK")
</pallas_src>

<mosaic_0001>
module attributes {stable_mosaic.version = 11 : i64} {
  func.func @_gcn_kernel(%arg0: i32, %arg1: memref<3x4xf32, #tpu.memory_space<smem>>, %arg2: memref<1x3x8x8xf32, #tpu.memory_space<vmem>>, %arg3: memref<1x8x32xf32, #tpu.memory_space<vmem>>, %arg4: memref<4x32xf32, #tpu.memory_space<vmem>>, %arg5: memref<4x32xf32, #tpu.memory_space<vmem>>, %arg6: memref<4x32xf32, #tpu.memory_space<vmem>>, %arg7: memref<1x8x32xf32, #tpu.memory_space<vmem>>) attributes {dimension_semantics = [#tpu.dimension_semantics<parallel>], iteration_bounds = array<i64: 2>, scalar_prefetch = 0 : i64, scratch_operands = 0 : i64, tpu.core_type = #tpu.core_type<tc>, window_params = [{transform_indices = @transform_0, window_bounds = array<i64: 3, 4>}, {transform_indices = @transform_1, window_bounds = array<i64: 1, 3, 8, 8>}, {transform_indices = @transform_2, window_bounds = array<i64: 1, 8, 32>}, {pipeline_mode = #tpu.pipeline_mode<synchronous>, transform_indices = @transform_3, window_bounds = array<i64: 4, 32>}, {pipeline_mode = #tpu.pipeline_mode<synchronous>, transform_indices = @transform_4, window_bounds = array<i64: 4, 32>}, {pipeline_mode = #tpu.pipeline_mode<synchronous>, transform_indices = @transform_5, window_bounds = array<i64: 4, 32>}, {transform_indices = @transform_6, window_bounds = array<i64: 1, 8, 32>}]} {
    %c0 = arith.constant 0 : index
    %c0_0 = arith.constant 0 : index
    %c0_1 = arith.constant 0 : index
    %0 = vector.load %arg3[%c0, %c0_0, %c0_1] : memref<1x8x32xf32, #tpu.memory_space<vmem>>, vector<1x8x32xf32>
    %1 = vector.shape_cast %0 : vector<1x8x32xf32> to vector<8x32xf32>
    %c0_2 = arith.constant 0 : index
    %c0_3 = arith.constant 0 : index
    %2 = vector.load %arg4[%c0_2, %c0_3] : memref<4x32xf32, #tpu.memory_space<vmem>>, vector<4x32xf32>
    %c0_4 = arith.constant 0 : index
    %c0_5 = arith.constant 0 : index
    %3 = vector.load %arg5[%c0_4, %c0_5] : memref<4x32xf32, #tpu.memory_space<vmem>>, vector<4x32xf32>
    %c0_6 = arith.constant 0 : index
    %c0_7 = arith.constant 0 : index
    %4 = vector.load %arg6[%c0_6, %c0_7] : memref<4x32xf32, #tpu.memory_space<vmem>>, vector<4x32xf32>
    %c0_8 = arith.constant 0 : index
    %c0_9 = arith.constant 0 : index
    %c0_10 = arith.constant 0 : index
    %c0_11 = arith.constant 0 : index
    %5 = vector.load %arg2[%c0_8, %c0_9, %c0_10, %c0_11] : memref<1x3x8x8xf32, #tpu.memory_space<vmem>>, vector<1x1x8x8xf32>
    %6 = vector.shape_cast %5 : vector<1x1x8x8xf32> to vector<8x8xf32>
    %cst = arith.constant dense<0.000000e+00> : vector<8xf32>
    %7 = vector.multi_reduction <add>, %6, %cst [1] : vector<8x8xf32> to vector<8xf32>
    %8 = vector.shape_cast %7 : vector<8xf32> to vector<8x1xf32>
    %c0_12 = arith.constant 0 : index
    %c1 = arith.constant 1 : index
    %c0_13 = arith.constant 0 : index
    %c0_14 = arith.constant 0 : index
    %9 = vector.load %arg2[%c0_12, %c1, %c0_13, %c0_14] : memref<1x3x8x8xf32, #tpu.memory_space<vmem>>, vector<1x1x8x8xf32>
    %10 = vector.shape_cast %9 : vector<1x1x8x8xf32> to vector<8x8xf32>
    %cst_15 = arith.constant dense<0.000000e+00> : vector<8xf32>
    %11 = vector.multi_reduction <add>, %10, %cst_15 [1] : vector<8x8xf32> to vector<8xf32>
    %12 = vector.shape_cast %11 : vector<8xf32> to vector<8x1xf32>
    %c0_16 = arith.constant 0 : index
    %c2 = arith.constant 2 : index
    %c0_17 = arith.constant 0 : index
    %c0_18 = arith.constant 0 : index
    %13 = vector.load %arg2[%c0_16, %c2, %c0_17, %c0_18] : memref<1x3x8x8xf32, #tpu.memory_space<vmem>>, vector<1x1x8x8xf32>
    %14 = vector.shape_cast %13 : vector<1x1x8x8xf32> to vector<8x8xf32>
    %cst_19 = arith.constant dense<0.000000e+00> : vector<8xf32>
    %15 = vector.multi_reduction <add>, %14, %cst_19 [1] : vector<8x8xf32> to vector<8xf32>
    %16 = vector.shape_cast %15 : vector<8xf32> to vector<8x1xf32>
    %17 = arith.addf %8, %12 : vector<8x1xf32>
    %18 = arith.addf %17, %16 : vector<8x1xf32>
    %cst_20 = arith.constant 1.000000e-10 : f32
    %19 = vector.broadcast %cst_20 : f32 to vector<8x1xf32>
    %20 = arith.addf %18, %19 : vector<8x1xf32>
    %21 = vector.extract_strided_slice %2 {offsets = [0, 0], sizes = [1, 32], strides = [1, 1]} : vector<4x32xf32> to vector<1x32xf32>
    %22 = vector.broadcast %21 : vector<1x32xf32> to vector<8x32xf32>
    %23 = arith.mulf %1, %22 : vector<8x32xf32>
    %cst_21 = arith.constant dense<0.000000e+00> : vector<8xf32>
    %24 = vector.multi_reduction <add>, %23, %cst_21 [1] : vector<8x32xf32> to vector<8xf32>
    %25 = vector.shape_cast %24 : vector<8xf32> to vector<8x1xf32>
    %26 = vector.extract_strided_slice %2 {offsets = [1, 0], sizes = [1, 32], strides = [1, 1]} : vector<4x32xf32> to vector<1x32xf32>
    %27 = vector.broadcast %26 : vector<1x32xf32> to vector<8x32xf32>
    %28 = arith.mulf %1, %27 : vector<8x32xf32>
    %cst_22 = arith.constant dense<0.000000e+00> : vector<8xf32>
    %29 = vector.multi_reduction <add>, %28, %cst_22 [1] : vector<8x32xf32> to vector<8xf32>
    %30 = vector.shape_cast %29 : vector<8xf32> to vector<8x1xf32>
    %31 = vector.extract_strided_slice %2 {offsets = [2, 0], sizes = [1, 32], strides = [1, 1]} : vector<4x32xf32> to vector<1x32xf32>
    %32 = vector.broadcast %31 : vector<1x32xf32> to vector<8x32xf32>
    %33 = arith.mulf %1, %32 : vector<8x32xf32>
    %cst_23 = arith.constant dense<0.000000e+00> : vector<8xf32>
    %34 = vector.multi_reduction <add>, %33, %cst_23 [1] : vector<8x32xf32> to vector<8xf32>
    %35 = vector.shape_cast %34 : vector<8xf32> to vector<8x1xf32>
    %36 = vector.extract_strided_slice %2 {offsets = [3, 0], sizes = [1, 32], strides = [1, 1]} : vector<4x32xf32> to vector<1x32xf32>
    %37 = vector.broadcast %36 : vector<1x32xf32> to vector<8x32xf32>
    %38 = arith.mulf %1, %37 : vector<8x32xf32>
    %cst_24 = arith.constant dense<0.000000e+00> : vector<8xf32>
    %39 = vector.multi_reduction <add>, %38, %cst_24 [1] : vector<8x32xf32> to vector<8xf32>
    %40 = vector.shape_cast %39 : vector<8xf32> to vector<8x1xf32>
    %c0_25 = arith.constant 0 : index
    %c0_26 = arith.constant 0 : index
    %41 = memref.load %arg1[%c0_25, %c0_26] : memref<3x4xf32, #tpu.memory_space<smem>>
    %42 = vector.broadcast %41 : f32 to vector<8x1xf32>
    %43 = arith.mulf %8, %42 : vector<8x1xf32>
    %c1_27 = arith.constant 1 : index
    %c0_28 = arith.constant 0 : index
    %44 = memref.load %arg1[%c1_27, %c0_28] : memref<3x4xf32, #tpu.memory_space<smem>>
    %45 = vector.broadcast %44 : f32 to vector<8x1xf32>
    %46 = arith.mulf %12, %45 : vector<8x1xf32>
    %47 = arith.addf %43, %46 : vector<8x1xf32>
    %c2_29 = arith.constant 2 : index
    %c0_30 = arith.constant 0 : index
    %48 = memref.load %arg1[%c2_29, %c0_30] : memref<3x4xf32, #tpu.memory_space<smem>>
    %49 = vector.broadcast %48 : f32 to vector<8x1xf32>
    %50 = arith.mulf %16, %49 : vector<8x1xf32>
    %51 = arith.addf %47, %50 : vector<8x1xf32>
    %c0_31 = arith.constant 0 : index
    %c1_32 = arith.constant 1 : index
    %52 = memref.load %arg1[%c0_31, %c1_32] : memref<3x4xf32, #tpu.memory_space<smem>>
    %53 = vector.broadcast %52 : f32 to vector<8x1xf32>
    %54 = arith.mulf %8, %53 : vector<8x1xf32>
    %c1_33 = arith.constant 1 : index
    %c1_34 = arith.constant 1 : index
    %55 = memref.load %arg1[%c1_33, %c1_34] : memref<3x4xf32, #tpu.memory_space<smem>>
    %56 = vector.broadcast %55 : f32 to vector<8x1xf32>
    %57 = arith.mulf %12, %56 : vector<8x1xf32>
    %58 = arith.addf %54, %57 : vector<8x1xf32>
    %c2_35 = arith.constant 2 : index
    %c1_36 = arith.constant 1 : index
    %59 = memref.load %arg1[%c2_35, %c1_36] : memref<3x4xf32, #tpu.memory_space<smem>>
    %60 = vector.broadcast %59 : f32 to vector<8x1xf32>
    %61 = arith.mulf %16, %60 : vector<8x1xf32>
    %62 = arith.addf %58, %61 : vector<8x1xf32>
    %c0_37 = arith.constant 0 : index
    %c2_38 = arith.constant 2 : index
    %63 = memref.load %arg1[%c0_37, %c2_38] : memref<3x4xf32, #tpu.memory_space<smem>>
    %64 = vector.broadcast %63 : f32 to vector<8x1xf32>
    %65 = arith.mulf %8, %64 : vector<8x1xf32>
    %c1_39 = arith.constant 1 : index
    %c2_40 = arith.constant 2 : index
    %66 = memref.load %arg1[%c1_39, %c2_40] : memref<3x4xf32, #tpu.memory_space<smem>>
    %67 = vector.broadcast %66 : f32 to vector<8x1xf32>
    %68 = arith.mulf %12, %67 : vector<8x1xf32>
    %69 = arith.addf %65, %68 : vector<8x1xf32>
    %c2_41 = arith.constant 2 : index
    %c2_42 = arith.constant 2 : index
    %70 = memref.load %arg1[%c2_41, %c2_42] : memref<3x4xf32, #tpu.memory_space<smem>>
    %71 = vector.broadcast %70 : f32 to vector<8x1xf32>
    %72 = arith.mulf %16, %71 : vector<8x1xf32>
    %73 = arith.addf %69, %72 : vector<8x1xf32>
    %c0_43 = arith.constant 0 : index
    %c3 = arith.constant 3 : index
    %74 = memref.load %arg1[%c0_43, %c3] : memref<3x4xf32, #tpu.memory_space<smem>>
    %75 = vector.broadcast %74 : f32 to vector<8x1xf32>
    %76 = arith.mulf %8, %75 : vector<8x1xf32>
    %c1_44 = arith.constant 1 : index
    %c3_45 = arith.constant 3 : index
    %77 = memref.load %arg1[%c1_44, %c3_45] : memref<3x4xf32, #tpu.memory_space<smem>>
    %78 = vector.broadcast %77 : f32 to vector<8x1xf32>
    %79 = arith.mulf %12, %78 : vector<8x1xf32>
    %80 = arith.addf %76, %79 : vector<8x1xf32>
    %c2_46 = arith.constant 2 : index
    %c3_47 = arith.constant 3 : index
    %81 = memref.load %arg1[%c2_46, %c3_47] : memref<3x4xf32, #tpu.memory_space<smem>>
    %82 = vector.broadcast %81 : f32 to vector<8x1xf32>
    %83 = arith.mulf %16, %82 : vector<8x1xf32>
    %84 = arith.addf %80, %83 : vector<8x1xf32>
    %cst_48 = arith.constant 0.000000e+00 : f32
    %85 = vector.broadcast %cst_48 : f32 to vector<8x32xf32>
    %86 = arith.mulf %25, %51 : vector<8x1xf32>
    %87 = vector.extract_strided_slice %3 {offsets = [0, 0], sizes = [1, 32], strides = [1, 1]} : vector<4x32xf32> to vector<1x32xf32>
    %88 = vector.broadcast %86 : vector<8x1xf32> to vector<8x32xf32>
    %89 = vector.broadcast %87 : vector<1x32xf32> to vector<8x32xf32>
    %90 = arith.mulf %88, %89 : vector<8x32xf32>
    %91 = arith.addf %85, %90 : vector<8x32xf32>
    %92 = vector.extract_strided_slice %4 {offsets = [0, 0], sizes = [1, 32], strides = [1, 1]} : vector<4x32xf32> to vector<1x32xf32>
    %93 = vector.broadcast %51 : vector<8x1xf32> to vector<8x32xf32>
    %94 = vector.broadcast %92 : vector<1x32xf32> to vector<8x32xf32>
    %95 = arith.mulf %93, %94 : vector<8x32xf32>
    %96 = arith.addf %91, %95 : vector<8x32xf32>
    %97 = arith.mulf %30, %62 : vector<8x1xf32>
    %98 = vector.extract_strided_slice %3 {offsets = [1, 0], sizes = [1, 32], strides = [1, 1]} : vector<4x32xf32> to vector<1x32xf32>
    %99 = vector.broadcast %97 : vector<8x1xf32> to vector<8x32xf32>
    %100 = vector.broadcast %98 : vector<1x32xf32> to vector<8x32xf32>
    %101 = arith.mulf %99, %100 : vector<8x32xf32>
    %102 = arith.addf %96, %101 : vector<8x32xf32>
    %103 = vector.extract_strided_slice %4 {offsets = [1, 0], sizes = [1, 32], strides = [1, 1]} : vector<4x32xf32> to vector<1x32xf32>
    %104 = vector.broadcast %62 : vector<8x1xf32> to vector<8x32xf32>
    %105 = vector.broadcast %103 : vector<1x32xf32> to vector<8x32xf32>
    %106 = arith.mulf %104, %105 : vector<8x32xf32>
    %107 = arith.addf %102, %106 : vector<8x32xf32>
    %108 = arith.mulf %35, %73 : vector<8x1xf32>
    %109 = vector.extract_strided_slice %3 {offsets = [2, 0], sizes = [1, 32], strides = [1, 1]} : vector<4x32xf32> to vector<1x32xf32>
    %110 = vector.broadcast %108 : vector<8x1xf32> to vector<8x32xf32>
    %111 = vector.broadcast %109 : vector<1x32xf32> to vector<8x32xf32>
    %112 = arith.mulf %110, %111 : vector<8x32xf32>
    %113 = arith.addf %107, %112 : vector<8x32xf32>
    %114 = vector.extract_strided_slice %4 {offsets = [2, 0], sizes = [1, 32], strides = [1, 1]} : vector<4x32xf32> to vector<1x32xf32>
    %115 = vector.broadcast %73 : vector<8x1xf32> to vector<8x32xf32>
    %116 = vector.broadcast %114 : vector<1x32xf32> to vector<8x32xf32>
    %117 = arith.mulf %115, %116 : vector<8x32xf32>
    %118 = arith.addf %113, %117 : vector<8x32xf32>
    %119 = arith.mulf %40, %84 : vector<8x1xf32>
    %120 = vector.extract_strided_slice %3 {offsets = [3, 0], sizes = [1, 32], strides = [1, 1]} : vector<4x32xf32> to vector<1x32xf32>
    %121 = vector.broadcast %119 : vector<8x1xf32> to vector<8x32xf32>
    %122 = vector.broadcast %120 : vector<1x32xf32> to vector<8x32xf32>
    %123 = arith.mulf %121, %122 : vector<8x32xf32>
    %124 = arith.addf %118, %123 : vector<8x32xf32>
    %125 = vector.extract_strided_slice %4 {offsets = [3, 0], sizes = [1, 32], strides = [1, 1]} : vector<4x32xf32> to vector<1x32xf32>
    %126 = vector.broadcast %84 : vector<8x1xf32> to vector<8x32xf32>
    %127 = vector.broadcast %125 : vector<1x32xf32> to vector<8x32xf32>
    %128 = arith.mulf %126, %127 : vector<8x32xf32>
    %129 = arith.addf %124, %128 : vector<8x32xf32>
    %130 = tpu.reciprocal %20 : vector<8x1xf32> -> vector<8x1xf32>
    %131 = vector.broadcast %130 : vector<8x1xf32> to vector<8x32xf32>
    %132 = arith.mulf %129, %131 : vector<8x32xf32>
    %cst_49 = arith.constant 0.000000e+00 : f32
    %133 = vector.broadcast %cst_49 : f32 to vector<8x32xf32>
    %134 = arith.maximumf %132, %133 : vector<8x32xf32>
    %c0_50 = arith.constant 0 : index
    %c0_51 = arith.constant 0 : index
    %c0_52 = arith.constant 0 : index
    %135 = vector.load %arg7[%c0_50, %c0_51, %c0_52] : memref<1x8x32xf32, #tpu.memory_space<vmem>>, vector<1x8x32xf32>
    %136 = vector.shape_cast %135 : vector<1x8x32xf32> to vector<8x32xf32>
    %137 = vector.shape_cast %134 : vector<8x32xf32> to vector<1x8x32xf32>
    tpu.vector_store %arg7[%c0_50, %c0_51, %c0_52], %137 {strides = array<i32>} : memref<1x8x32xf32, #tpu.memory_space<vmem>>, vector<1x8x32xf32>,
    return
  }
  func.func @transform_0(%arg0: i32) -> (i32, i32) {
    %c0_i32 = arith.constant 0 : i32
    %c0_i32_0 = arith.constant 0 : i32
    %c0_i32_1 = arith.constant 0 : i32
    return %c0_i32, %c0_i32_0 : i32, i32
  }
  func.func @transform_1(%arg0: i32) -> (i32, i32, i32, i32) {
    %c0_i32 = arith.constant 0 : i32
    %c0_i32_0 = arith.constant 0 : i32
    %c0_i32_1 = arith.constant 0 : i32
    %c0_i32_2 = arith.constant 0 : i32
    return %arg0, %c0_i32, %c0_i32_0, %c0_i32_1 : i32, i32, i32, i32
  }
  func.func @transform_2(%arg0: i32) -> (i32, i32, i32) {
    %c0_i32 = arith.constant 0 : i32
    %c0_i32_0 = arith.constant 0 : i32
    %c0_i32_1 = arith.constant 0 : i32
    return %arg0, %c0_i32, %c0_i32_0 : i32, i32, i32
  }
  func.func @transform_3(%arg0: i32) -> (i32, i32) {
    %c0_i32 = arith.constant 0 : i32
    %c0_i32_0 = arith.constant 0 : i32
    %c0_i32_1 = arith.constant 0 : i32
    return %c0_i32, %c0_i32_0 : i32, i32
  }
  func.func @transform_4(%arg0: i32) -> (i32, i32) {
    %c0_i32 = arith.constant 0 : i32
    %c0_i32_0 = arith.constant 0 : i32
    %c0_i32_1 = arith.constant 0 : i32
    return %c0_i32, %c0_i32_0 : i32, i32
  }
  func.func @transform_5(%arg0: i32) -> (i32, i32) {
    %c0_i32 = arith.constant 0 : i32
    %c0_i32_0 = arith.constant 0 : i32
    %c0_i32_1 = arith.constant 0 : i32
    return %c0_i32, %c0_i32_0 : i32, i32
  }
  func.func @transform_6(%arg0: i32) -> (i32, i32, i32) {
    %c0_i32 = arith.constant 0 : i32
    %c0_i32_0 = arith.constant 0 : i32
    %c0_i32_1 = arith.constant 0 : i32
    return %arg0, %c0_i32, %c0_i32_0 : i32, i32, i32
  }
}

</mosaic_0001>

<bundles_post_ra>
// kernel: tpu_custom_call.1
= control target key start
LH: loop header
LB: loop body
LE: loop exit
PB: predicated region body
PF: predicated region fallthrough
CT: control target
= control target key end

     0   :  { %s1205_s0 = inlined_call_operand.hbm [shape: f32[3,4], index: 0, kind: input, shape index: {}]   ;;  %s1206_s1 = inlined_call_operand.hbm [shape: f32[2,3,8,8], index: 1, kind: input, shape index: {}]   ;;  %s1207_s2 = inlined_call_operand.hbm [shape: f32[2,8,32], index: 2, kind: input, shape index: {}]   ;;  %s1208_s3 = inlined_call_operand.vmem [shape: f32[4,32], index: 3, kind: input, shape index: {}]   ;;  %s1209_s4 = inlined_call_operand.hbm [shape: f32[4,32], index: 4, kind: input, shape index: {}]   ;;  %s1210_s5 = inlined_call_operand.vmem [shape: f32[4,32], index: 5, kind: input, shape index: {}]   ;;  %s1211_s6 = inlined_call_operand.hbm [shape: f32[2,8,32], index: 6, kind: output, shape index: {}]  }
   0x1   :  { %1216 = sst [smem:[#allocation17_spill]] %s1205_s0 }
   0x2   :  { %1217 = sst [smem:[#allocation18_spill]] %s1206_s1 }
   0x3   :  { %1218 = sst [smem:[#allocation19_spill]] %s1209_s4 }
   0x4   :  { %11 = vsyncpa [#allocation5], 0 }
   0x5   :  { %12 = vsyncpa [#allocation3], 0 }
   0x6   :  { %14 = vsyncpa [#allocation3 + $0x1], 0 }
   0x7   :  { %15 = vsyncpa [#allocation8], 0 }
   0x8   :  { %17 = vsyncpa [#allocation8 + $0x1], 0 }
   0x9   :  { %18 = vsyncpa [#allocation4], 0 }
   0xa   :  { %20 = vsyncpa [#allocation4 + $0x1], 0  ;;  %s936_s21 = smov 0   ;;  %s938_s22 = smov 0  }
   0xb   :  { %s940_s23 = smov 0   ;;  %s942_s24 = smov 0  }
   0xc LB: > { %s957_s25 = sadd.s32 4294967295, %s892_s24   ;;  %s614_s26 = sadd.s32 4294967294, %s892_s24   ;;  %s892_s24 = sphi %s942_s24, %s1244_s24   ;;  %s888_s23 = sphi %s940_s23, %s1243_s23   ;;  %s884_s22 = sphi %s938_s22, %s1242_s22   ;;  %s880_s21 = sphi %s936_s21, %s1241_s21  }
   0xd   : > { %s961_s27 = sadd.s32 1, %s892_s24   ;;  %s54_s28 = sadd.s32 1, %s888_s23 }
   0xe   : > { %s51_s29 = ssub.s32 %s892_s24, %s961_s27  ;;  %p61_p0 = scmp.ne.s32.totalorder %s888_s23, %s884_s22 }
   0xf   : > { %p52_p1 = scmp.eq.s32.totalorder %s51_s29, 0  ;;  %p62_p2 = scmp.eq.s32.totalorder %s892_s24, 0 }
  0x10   : > { %p67_p3 = scmp.ne.s32.totalorder %s884_s22, %s880_s21  ;;  %p1212_p4 = scmp.eq.s32.totalorder %s957_s25, 0 }
  0x11   : > { %s973_s30 = scalar_select %p52_p1, %s888_s23, %s54_s28  }
  0x12   : > { %p975_p5 = por %p62_p2, %p61_p0  ;;  %p981_p6 = por %p1212_p4, %p67_p3 }
  0x13   : > { %1219 = sst [smem:[#allocation16_spill]] %s973_s30  ;;  %p180_p7 = scmp.eq.s32.totalorder %s957_s25, 1 }
  0x14   : > { %s1221_s8 = scalar_select %p981_p6, 1, 0 }
  0x15   : > { %p186_p8 = scmp.eq.s32.totalorder %s614_s26, 1  ;;  %p615_p9 = scmp.ge.s32.totalorder %s892_s24, 1 }
  0x16   : > { %p193_p10 = scmp.lt.s32.totalorder %s892_s24, 3  ;;  %p988_p11 = por %p180_p7, %p61_p0 }
  0x17   : > { %p992_p12 = por %p186_p8, %p67_p3  ;;  %s894_s12 = smov [#allocation9]  }
  0x18   : > { %s1222_s9 = scalar_select %p988_p11, 1, 0 }
  0x19   : > { %s1223_s10 = scalar_select %p992_p12, 1, 0 }
  0x1a   : > { %p996_p13 = pnand %p615_p9, %p193_p10  ;;  %s218_s13 = sshll.u32 %s894_s12, 4  ;;  %s219_s13 = int_to_ptr.vmem [resolvable:$true] %s218_s13 }
  0x1b   : > { %p681_p4 = scmp.lt.s32.totalorder %s892_s24, 2  ;;  %p1225_p0 = scmp.eq.s32.totalorder %s957_s25, 0 }
  0x1c   : > { %s1224_s11 = scalar_select %p996_p13, 1, 0 }
  0x1d   : > { %p661_p2 = pneg %p996_p13  ;;  %p1012_p3 = pnand %p681_p4, %p975_p5 }
  0x1e   : > { %s1017_s16 = sand.u32 1, %s888_s23   ;;  %s734_s17 = scalar_lea.vmem %s219_s13, 64 }
  0x1f   : > { %p1006_p7 = pnand %p661_p2, %p1225_p0  ;;  %p735_p9 = scmp.ne.s32.totalorder %s219_s13, %s734_s17 }
  0x20   : > { %p742_p12 = scmp.lt.s32.totalorder %s219_s13, %s219_s13  ;;  %p743_p11 = scmp.lt.s32.totalorder %s734_s17, %s734_s17 }
  0x21   : > { %p725_p8 = pneg %p1006_p7 }
  0x22   : > { %p744_p2 = por %p743_p11, %p742_p12 }
  0x23   : > { %p737_p10 = pnand %p735_p9, %p725_p8 }
  0x25   : > { %p738_p1 = pneg %p737_p10 }
  0x27   : > { %p745_p0 = pnand %p744_p2, %p738_p1 }
  0x29   : > { %748 = shalt.err (!%p745_p0)
}
  0x2a   : > { %s1228_s4 = sld [smem:[#allocation19_spill]]  ;;  %s644_s20 = smul.u32 24, %s1017_s16 }
  0x2b   : > { %s895_s26 = smov [#allocation2]   ;;  %s1229_s0 = sld [smem:[#allocation17_spill]] }
  0x2c   : > { %s645_s7 = smul.u32 384, %s892_s24  ;;  %s236_s12 = scalar_lea.vmem [#allocation6], %s644_s20 }
  0x2d   : > { %s243_s17 = sshll.u32 %s236_s12, 4  ;;  %s1230_s1 = sld [smem:[#allocation18_spill]]  ;;  %s1038_s17 = int_to_ptr.vmem [resolvable:$true] %s243_s17 }
  0x2e   : > { %p762_p5 = pneg %p1012_p3 }
  0x30   : > { %667 = dma.hbm_to_vmem [thread:$0]  (!%p1006_p7), %s1228_s4, 64, %s219_s13, [#allocation8]  }
  0x31   : > { %664 = dma.hbm_to_smem (!%p1006_p7), %s1229_s0, 64, %s895_s26, [#allocation5]  }
  0x32   : > { %s253_s13 = sand.u32 1, %s892_s24   ;;  %s233_s4 = scalar_lea.sflag [#allocation3], %s1017_s16 }
  0x33   : > { %s1036_s19 = scalar_lea.hbm %s1230_s1, %s645_s7  ;;  %s765_s30 = scalar_lea.hbm %s1230_s1, 768 }
  0x34   : > { %s760_s14 = scalar_lea.hbm %s1036_s19, 384  ;;  %p766_p1 = scmp.lt.s32.totalorder %s1036_s19, %s1230_s1 }
  0x35   : > { %p761_p4 = scmp.ne.s32.totalorder %s1036_s19, %s760_s14  ;;  %p767_p7 = scmp.lt.s32.totalorder %s765_s30, %s760_s14 }
  0x37   : > { %p763_p11 = pnand %p762_p5, %p761_p4  ;;  %p768_p8 = por %p767_p7, %p766_p1 }
  0x39   : > { %p764_p12 = pneg %p763_p11 }
  0x3b   : > { %p769_p9 = pnand %p768_p8, %p764_p12 }
  0x3d   : > { %772 = shalt.err (!%p769_p9)
}
  0x3e   : > { %s773_s7 = scalar_lea.vmem %s1038_s17, 384  ;;  %s896_s12 = smov [#allocation6]  }
  0x3f   : > { %p774_p10 = scmp.ne.s32.totalorder %s1038_s17, %s773_s7  ;;  %s778_s18 = sshll.u32 %s896_s12, 4  ;;  %s779_s18 = int_to_ptr.vmem [resolvable:$false] %s778_s18 }
  0x40   : > { %s780_s20 = scalar_lea.vmem %s779_s18, 768  ;;  %p781_p4 = scmp.lt.s32.totalorder %s1038_s17, %s779_s18 }
  0x41   : > { %p776_p2 = pnand %p774_p10, %p762_p5  ;;  %p782_p11 = scmp.lt.s32.totalorder %s780_s20, %s773_s7 }
  0x43   : > { %p777_p0 = pneg %p776_p2  ;;  %p783_p6 = por %p782_p11, %p781_p4 }
  0x45   : > { %p784_p1 = pnand %p783_p6, %p777_p0 }
  0x47   : > { %787 = shalt.err (!%p784_p1)
}
  0x48   : > { %s897_s14 = smov 128   ;;  %s898_s26 = smov 8  }
  0x49   : > { %671 = dma.hbm_to_vmem [thread:$0]  (!%p1012_p3), %s1036_s19, 384, %s1038_s17, %s233_s4, %s897_s14, %s897_s14, %s898_s26  }
  0x4a   : > { %s620_s30 = sshll.u32 %s1017_s16, 3  ;;  %s621_s28 = sshll.u32 %s892_s24, 7 }
  0x4b   : > { %s1073_s12 = scalar_lea.hbm %s1207_s2, %s621_s28  ;;  %s257_s18 = scalar_lea.vmem [#allocation7], %s620_s30 }
  0x4c   : > { %s264_s20 = sshll.u32 %s257_s18, 4  ;;  %s254_s0 = scalar_lea.sflag [#allocation8], %s253_s13  ;;  %s265_s20 = int_to_ptr.vmem [resolvable:$true] %s264_s20 }
  0x4d   : > { %s788_s1 = scalar_lea.hbm %s1073_s12, 128  ;;  %s793_s17 = scalar_lea.hbm %s1207_s2, 256 }
  0x4e   : > { %p789_p6 = scmp.ne.s32.totalorder %s1073_s12, %s788_s1  ;;  %p794_p8 = scmp.lt.s32.totalorder %s1073_s12, %s1207_s2 }
  0x4f   : > { %p795_p9 = scmp.lt.s32.totalorder %s793_s17, %s788_s1 }
  0x50   : > { %p791_p12 = pnand %p789_p6, %p762_p5 }
  0x51   : > { %p796_p10 = por %p795_p9, %p794_p8 }
  0x52   : > { %p792_p7 = pneg %p791_p12 }
  0x54   : > { %p797_p2 = pnand %p796_p10, %p792_p7 }
  0x56   : > { %800 = shalt.err (!%p797_p2)
}
  0x57   : > { %s801_s26 = scalar_lea.vmem %s265_s20, 128  ;;  %s899_s13 = smov [#allocation7]  }
  0x58   : > { %p802_p0 = scmp.ne.s32.totalorder %s265_s20, %s801_s26  ;;  %s806_s30 = sshll.u32 %s899_s13, 4  ;;  %s807_s30 = int_to_ptr.vmem [resolvable:$false] %s806_s30 }
  0x59   : > { %s808_s28 = scalar_lea.vmem %s807_s30, 256  ;;  %p809_p1 = scmp.lt.s32.totalorder %s265_s20, %s807_s30 }
  0x5a   : > { %p804_p4 = pnand %p802_p0, %p762_p5  ;;  %p810_p6 = scmp.lt.s32.totalorder %s808_s28, %s801_s26 }
  0x5c   : > { %p805_p11 = pneg %p804_p4  ;;  %p811_p12 = por %p810_p6, %p809_p1 }
  0x5e   : > { %p812_p13 = pnand %p811_p12, %p805_p11 }
  0x60   : > { %815 = shalt.err (!%p812_p13)
}
  0x61   : > { %674 = dma.hbm_to_vmem [thread:$0]  (!%p1012_p3), %s1073_s12, 128, %s265_s20, %s254_s0  }
  0x62   : > { %p1231_p7 = scmp.ne.s32.totalorder %s1224_s11, 0 }
  0x63   : > { %p1232_p8 = scmp.eq.s32.totalorder (!%p1231_p7), %s957_s25, 0 }
  0x64   : > { %273 = sbr.rel (%p1231_p7) target bundleno = 305 (0x131), region = 44 }
  0x69   : > { %859 = dma.done.wait (%p1232_p8), [#allocation5], 64   ;;  %p1233_p5 = pmov %p1232_p8 }
  0x6a   : > { %s1102_s1 = sand.u32 1, %s884_s22   ;;  %p1234_p13 = scmp.ne.s32.totalorder %s1221_s8, 0 }
  0x6b   : > { %861 = vsyncadd (%p1233_p5), [#allocation5], 4294967232  ;;  %s646_s29 = smul.u32 24, %s1102_s1  ;;  %s280_s7 = scalar_lea.sflag [#allocation3], %s1102_s1 }
  0x6d   : > { %s283_s15 = scalar_lea.vmem [#allocation6], %s646_s29 }
  0x6e   : > { %863 = dma.done.wait (%p1234_p13), %s280_s7, 384  }
  0x6f   : > { %865 = vsyncadd (%p1234_p13), %s280_s7, 4294966912  ;;  %s288_s0 = sand.u32 1, %s957_s25   ;;  %s624_s11 = sshll.u32 %s1102_s1, 3 }
  0x70   : > { %s289_s12 = scalar_lea.sflag [#allocation8], %s288_s0  ;;  %s292_s18 = scalar_lea.vmem [#allocation7], %s624_s11 }
  0x71   : > { %867 = dma.done.wait (%p1234_p13), %s289_s12, 128  }
  0x72   : > { %869 = vsyncadd (%p1234_p13), %s289_s12, 4294967168  ;;  %p1235_p3 = pmov %p1233_p5 }
  0x74   : > { %871 = dma.done.wait (%p1235_p3), [#allocation8], 64   ;;  %p1236_p9 = pmov %p1235_p3 }
  0x76   : > { %873 = vsyncadd (%p1236_p9), [#allocation8], 4294967232 }
  0x77   : > { %301 = sfence }
  0x78   : > { %v335_v0 = vld [vmem:[%s283_s15] sm:$0xff]  ;;  %vm336_vm0 = vcmask 64512   ;;  %v627_v1 = vld [vmem:[%s283_s15 + $0x8] sm:$0xff]  ;;  %v628_v2 = vld [vmem:[%s283_s15 + $0x10] sm:$0xff]  ;;  %v353_v3 = vlaneseq  ;;  %vm358_vm1 = vcmask 261120   ;;  %s631_s4 = sld [smem:[#allocation2 + $0x1]] }
  0x79   : > { %v337_v4 = vsel %vm336_vm0, %v335_v0, 0.0  ;;  %v347_v5 = vsel %vm336_vm0, %v628_v2, 0.0  ;;  %v342_v7 = vsel %vm336_vm0, %v627_v1, 0.0  ;;  %v332_v8 = vld [vmem:[%s1208_s3] sm:$0xf]  ;;  %v331_v13 = vld [vmem:[%s292_s18] sm:$0xff] }
  0x7a   : > { %338 = vadd.xlane.f32.xlu0 %v337_v4  ;;  %348 = vadd.xlane.f32.xlu1 %v347_v5  ;;  %v354_v6 = vshrl.u32 %v353_v3, 7  ;;  %s386_s16 = sld [smem:[#allocation2]]  ;;  %v334_v44 = vld [vmem:[%s1210_s5] sm:$0xf]  ;;  %s641_s18 = sshll.u32 %s957_s25, 7 }
  0x7b   : > { %s632_s17 = sld [smem:[#allocation2 + $0x81]]  ;;  %v333_v46 = vld [vmem:[#allocation9] sm:$0xf]  ;;  %s330_s8 = scalar_lea.vmem [#allocation10], %s624_s11 }
  0x7c   : > { %v1125_v9 = vsub.s32 1, %v354_v6  ;;  %v1127_v10 = vsub.s32 0, %v354_v6  ;;  %v1129_v11 = vsub.s32 3, %v354_v6  ;;  %v1131_v12 = vsub.s32 2, %v354_v6  ;;  %s629_s19 = sld [smem:[#allocation2 + $0x80]]  ;;  %s500_s20 = sshll.u32 %s330_s8, 4  ;;  %s501_s20 = int_to_ptr.vmem [resolvable:$true] %s500_s20 }
  0x7d   : > { %s633_s14 = sld [smem:[#allocation2 + $0x101]]  ;;  %p1237_p2 = scmp.ne.s32.totalorder %s1222_s9, 0 }
  0x7e   : > { %343 = vadd.xlane.f32.xlu0 %v342_v7  ;;  %v365_v14 = vrot.slane %v332_v8, %v1125_v9  ;;  %v356_v15 = vrot.slane %v332_v8, %v1127_v10  ;;  %v381_v16 = vrot.slane %v332_v8, %v1129_v11  ;;  %v373_v17 = vrot.slane %v332_v8, %v1131_v12  ;;  %s630_s26 = sld [smem:[#allocation2 + $0x100]] }
  0x7f   : > { %s635_s13 = sld [smem:[#allocation2 + $0x82]]  ;;  %v398_v28 = vstv %s631_s4  ;;  %v440_v57 = vrot.slane %v334_v44, %v1127_v10  ;;  %v434_v60 = vrot.slane %v333_v46, %v1127_v10  ;;  %v447_v0 = vrot.slane %v333_v46, %v1125_v9 }
  0x80   : > { %v366_v18 = vmul.f32 %v365_v14, %v331_v13  ;;  %v357_v19 = vmul.f32 %v356_v15, %v331_v13  ;;  %v382_v20 = vmul.f32 %v381_v16, %v331_v13  ;;  %v374_v21 = vmul.f32 %v373_v17, %v331_v13  ;;  %s1141_s30 = sld [smem:[#allocation2 + $0x2]] }
  0x81   : > { %s1143_s28 = sld [smem:[#allocation2 + $0x83]]  ;;  %v387_v30 = vstv %s386_s16  ;;  %v401_v31 = vstv %s632_s17  ;;  %v453_v5 = vrot.slane %v334_v44, %v1125_v9  ;;  %v460_v16 = vrot.slane %v333_v46, %v1131_v12  ;;  %s498_s17 = scalar_lea.hbm %s1211_s6, %s641_s18 }
  0x82   : > { %v367_v22 = vsel %vm358_vm1, %v366_v18, 0.0  ;;  %v359_v23 = vsel %vm358_vm1, %v357_v19, 0.0  ;;  %v383_v24 = vsel %vm358_vm1, %v382_v20, 0.0  ;;  %v375_v25 = vsel %vm358_vm1, %v374_v21, 0.0  ;;  %s1145_s29 = sld [smem:[#allocation2 + $0x102]] }
  0x83   : > { %368 = vadd.xlane.f32.xlu0 %v367_v22  ;;  %360 = vadd.xlane.f32.xlu1 %v359_v23  ;;  %s1147_s7 = sld [smem:[#allocation2 + $0x3]]  ;;  %v405_v29 = vstv %s633_s14  ;;  %v390_v32 = vstv %s629_s19  ;;  %v466_v9 = vrot.slane %v334_v44, %v1131_v12  ;;  %v473_v23 = vrot.slane %v333_v46, %v1129_v11  ;;  %s487_s19 = scalar_lea.sflag [#allocation4], %s1102_s1 }
  0x84   : > { %s1149_s15 = sld [smem:[#allocation2 + $0x103]]  ;;  %v394_v33 = vstv %s630_s26  ;;  %s816_s14 = scalar_lea.vmem %s501_s20, 128 }
  0x85   : > { %v412_v34 = vstv %s635_s13  ;;  %p817_p10 = scmp.ne.s32.totalorder %s501_s20, %s816_s14  ;;  %s900_s26 = smov [#allocation10]  }
  0x86   : > { %v409_v39 = vstv %s1141_s30  ;;  %s820_s25 = sshll.u32 %s900_s26, 4  ;;  %s821_s25 = int_to_ptr.vmem [resolvable:$false] %s820_s25 }
  0x87   : > { %384 = vadd.xlane.f32.xlu0 %v383_v24  ;;  %376 = vadd.xlane.f32.xlu1 %v375_v25  ;;  %v423_v49 = vstv %s1143_s28  ;;  %p818_p0 = pnand %p817_p10, %p1237_p2  ;;  %s822_s11 = scalar_lea.vmem %s821_s25, 256 }
  0x88   : > { %v416_v50 = vstv %s1145_s29  ;;  %p823_p11 = scmp.lt.s32.totalorder %s501_s20, %s821_s25  ;;  %p824_p1 = scmp.lt.s32.totalorder %s822_s11, %s816_s14 }
  0x89   : > { %v420_v52 = vstv %s1147_s7  ;;  %p819_p4 = pneg %p818_p0 }
  0x8a   : > { %v427_v59 = vstv %s1149_s15  ;;  %p825_p6 = por %p824_p1, %p823_p11 }
  0x8c   : > { %p826_p12 = pnand %p825_p6, %p819_p4 }
 0x103   : > { %v339_v26 = vpop.xlane.xlu0 %338  ;;  %v349_v27 = vpop.xlane.xlu1 %348 }
 0x104   : > { %v399_v36 = vmul.f32 %v398_v28, %v339_v26  ;;  %v406_v37 = vmul.f32 %v405_v29, %v349_v27  ;;  %v388_v38 = vmul.f32 %v387_v30, %v339_v26  ;;  %v395_v43 = vmul.f32 %v394_v33, %v349_v27 }
 0x105   : > { %v410_v53 = vmul.f32 %v409_v39, %v339_v26  ;;  %v417_v63 = vmul.f32 %v416_v50, %v349_v27  ;;  %v421_v4 = vmul.f32 %v420_v52, %v339_v26  ;;  %v428_v6 = vmul.f32 %v427_v59, %v349_v27 }
 0x107   : > { %v344_v35 = vpop.xlane.xlu0 %343 }
 0x108   : > { %v350_v40 = vadd.f32 %v344_v35, %v339_v26  ;;  %v402_v41 = vmul.f32 %v401_v31, %v344_v35  ;;  %v391_v42 = vmul.f32 %v390_v32, %v344_v35  ;;  %v413_v45 = vmul.f32 %v412_v34, %v344_v35 }
 0x109   : > { %v424_v61 = vmul.f32 %v423_v49, %v344_v35 }
 0x10a   : > { %v403_v47 = vadd.f32 %v402_v41, %v399_v36  ;;  %v392_v48 = vadd.f32 %v391_v42, %v388_v38  ;;  %v351_v51 = vadd.f32 %v350_v40, %v349_v27  ;;  %v414_v62 = vadd.f32 %v413_v45, %v410_v53 }
 0x10b   : > { %v425_v14 = vadd.f32 %v424_v61, %v421_v4  ;;  %v479_v27 = vrot.slane %v334_v44, %v1129_v11 }
 0x10c   : > { %v407_v54 = vadd.f32 %v406_v37, %v403_v47  ;;  %v369_v55 = vpop.xlane.xlu0 %368  ;;  %v396_v56 = vadd.f32 %v395_v43, %v392_v48  ;;  %v361_v58 = vpop.xlane.xlu1 %360  ;;  %v352_v1 = vadd.f32 1e-10, %v351_v51  ;;  %v418_v15 = vadd.f32 %v417_v63, %v414_v62 }
 0x10d   : > { %v429_v22 = vadd.f32 %v428_v6, %v425_v14 }
 0x10e   : > { %v443_v2 = vmul.f32 %v407_v54, %v369_v55  ;;  %v430_v3 = vmul.f32 %v396_v56, %v361_v58  ;;  %v441_v8 = vmul.f32 %v440_v57, %v396_v56  ;;  %721 = vrcp.f32 %v352_v1 }
 0x10f   : > { %v454_v20 = vmul.f32 %v453_v5, %v407_v54  ;;  %v467_v28 = vmul.f32 %v466_v9, %v418_v15  ;;  %v480_v32 = vmul.f32 %v479_v27, %v429_v22 }
 0x110   : > { %v377_v7 = vpop.xlane.xlu1 %376  ;;  %v435_v13 = vmul.f32 %v434_v60, %v430_v3  ;;  %v448_v10 = vmul.f32 %v447_v0, %v443_v2  ;;  %v385_v19 = vpop.xlane.xlu0 %384 }
 0x111   : > { %v456_v18 = vmul.f32 %v418_v15, %v377_v7  ;;  %v469_v24 = vmul.f32 %v429_v22, %v385_v19 }
 0x112   : > { %v442_v17 = vadd.f32 %v441_v8, %v435_v13 }
 0x113   : > { %v461_v26 = vmul.f32 %v460_v16, %v456_v18  ;;  %v474_v30 = vmul.f32 %v473_v23, %v469_v24 }
 0x114   : > { %v449_v21 = vadd.f32 %v448_v10, %v442_v17 }
 0x116   : > { %v455_v25 = vadd.f32 %v454_v20, %v449_v21 }
 0x118   : > { %v462_v29 = vadd.f32 %v461_v26, %v455_v25 }
 0x11a   : > { %v468_v31 = vadd.f32 %v467_v28, %v462_v29 }
 0x11b   : > { %v722_v35 = vpop.eup %721 }
 0x11c   : > { %v475_v33 = vadd.f32 %v474_v30, %v468_v31 }
 0x11e   : > { %v481_v34 = vadd.f32 %v480_v32, %v475_v33 }
 0x120   : > { %v483_v12 = vmul.f32 %v722_v35, %v481_v34 }
 0x122   : > { %v484_v36 = vmax.f32 %v483_v12, 0.0 }
 0x124   : > { %485 = vst.msk [vmem:[%s330_s8] sm:$0xff] %vm358_vm1, %v484_v36 }
 0x125   : > { %829 = shalt.err (!%p826_p12)
}
 0x126   : > { %s830_s13 = scalar_lea.hbm %s498_s17, 128  ;;  %s834_s28 = scalar_lea.hbm %s1211_s6, 256 }
 0x127   : > { %p831_p7 = scmp.ne.s32.totalorder %s498_s17, %s830_s13  ;;  %p835_p13 = scmp.lt.s32.totalorder %s498_s17, %s1211_s6 }
 0x128   : > { %p836_p3 = scmp.lt.s32.totalorder %s834_s28, %s830_s13 }
 0x129   : > { %p832_p8 = pnand %p831_p7, %p1237_p2 }
 0x12a   : > { %p837_p9 = por %p836_p3, %p835_p13 }
 0x12b   : > { %p833_p5 = pneg %p832_p8 }
 0x12d   : > { %p838_p10 = pnand %p837_p9, %p833_p5 }
 0x12f   : > { %841 = shalt.err (!%p838_p10)
}
 0x130   : > { %659 = dma.vmem_to_hbm [thread:$0]  (%p1237_p2), %s501_s20, 128, %s498_s17, %s487_s19  }
 0x131 PF: > { %s512_s15 = sand.u32 1, %s880_s21   ;;  %p1238_p0 = scmp.ne.s32.totalorder %s1223_s10, 0 }
 0x132   : > { %p1239_p4 = scmp.ge.s32.totalorder %s892_s24, 2  ;;  %s513_s0 = scalar_lea.sflag [#allocation4], %s512_s15 }
 0x134   : > { %p676_p11 = pnand %p1239_p4, %p1238_p0 }
 0x136   : > { %p677_p1 = pneg %p676_p11 }
 0x138   : > { %875 = dma.done.wait (%p677_p1), %s513_s0, 128  }
 0x139   : > { %877 = vsyncadd (%p677_p1), %s513_s0, 4294967168  ;;  %s1240_s12 = sld [smem:[#allocation16_spill]]  ;;  %p23_p6 = scmp.ge.s32.totalorder %s961_s27, 4  }
 0x13a   : > { %s1241_s21 = smov %s884_s22  ;;  %s1242_s22 = smov %s888_s23 }
 0x13b   : > { %s1244_s24 = smov %s961_s27  ;;  %25 = sbr.rel (!%p23_p6) target bundleno = 12 (0xc), region = 113 }
 0x13f   : > { %s1243_s23 = smov %s1240_s12 }
 0x140   :  { %518 = vsyncpa [#allocation3], 1 }
 0x141   :  { %520 = vsyncpa [#allocation3 + $0x1], 1 }
 0x142   :  { %521 = vsyncpa [#allocation8], 1 }
 0x143   :  { %523 = vsyncpa [#allocation8 + $0x1], 1 }
 0x144   :  { %524 = vsyncpa [#allocation4], 1 }
 0x145   :  { %526 = vsyncpa [#allocation4 + $0x1], 1 }
 0x146   :  { %527 = vsyncpa [#allocation5], 1 }
 0x147   :  { %529 = vsyncpa [#allocation5 + $0x1], 1 }

</bundles_post_ra>
